<compile_context>
chip_gen: v6e
topology: v6e:2x2x1
jax: 0.10.0
libtpu: 0.0.40
codegen_flags: <defaults>
</compile_context>

<pallas_src>
import functools

import jax
import jax.numpy as jnp
from jax.experimental import pallas as pl
from jax.experimental.pallas import tpu as pltpu

_EPS = 1e-5


# ---------------------------------------------------------------------------
# Kernels
# ---------------------------------------------------------------------------
def _moments(x, two_pass):
    # x: (Bt, C, T) float32; reduce over the channel (sublane) axis.
    mu = jnp.mean(x, axis=1, keepdims=True)
    if two_pass:
        d = x - mu
        var = jnp.mean(d * d, axis=1, keepdims=True)
    else:
        # Single-pass E[x^2] - mu^2 (cancellation-prone; opt-in only).
        var = jnp.mean(x * x, axis=1, keepdims=True) - mu * mu
    return mu, var


def _biasfree_kernel(x_ref, w_ref, o_ref, *, two_pass):
    # x_ref: (Bt, C, T), w_ref: (1, C, 1), o_ref: (Bt, C, T)
    x = x_ref[...].astype(jnp.float32)
    w = w_ref[...].astype(jnp.float32)
    _, var = _moments(x, two_pass)
    inv = jax.lax.rsqrt(var + _EPS)            # EUP rsqrt, off the VALU path
    # NOTE: mean is intentionally NOT subtracted (BiasFree_LayerNorm semantics;
    # var itself is still the centered variance, matching torch.var).
    o_ref[...] = (x * inv * w).astype(o_ref.dtype)


def _withbias_kernel(x_ref, w_ref, b_ref, o_ref, *, two_pass):
    x = x_ref[...].astype(jnp.float32)
    w = w_ref[...].astype(jnp.float32)
    b = b_ref[...].astype(jnp.float32)
    mu, var = _moments(x, two_pass)
    inv = jax.lax.rsqrt(var + _EPS)
    o_ref[...] = ((x - mu) * inv * w + b).astype(o_ref.dtype)


# ---------------------------------------------------------------------------
# Tiling / VMEM budgeting
# ---------------------------------------------------------------------------
def _largest_divisor_leq(n, cap):
    cap = max(1, min(n, int(cap)))
    for d in range(cap, 0, -1):
        if n % d == 0:
            return d
    return 1


def _choose_tiling(B, C, HW, target_block_bytes):
    """Return (batch_tile, token_tile, grid). Sized on the f32 working set."""
    per_image_f32 = C * HW * 4
    if per_image_f32 <= target_block_bytes:
        # Whole image(s) fit in one block: tile the batch axis instead of
        # issuing one tiny grid step per image (amortizes per-step overhead).
        bt = _largest_divisor_leq(B, target_block_bytes // per_image_f32)
        # Keep >=2 parallel grid steps when there is enough total work so
        # both v7x TensorCores are fed (and the split stays balanced).
        if B // bt < 2 and B >= 2 and B * per_image_f32 > (2 << 20):
            bt = _largest_divisor_leq(B, B // 2)
        return bt, HW, (B // bt, 1)

    # Large image: tile the token (h*w) axis in multiples of 128 lanes.
    t = max(128, (target_block_bytes // (C * 4) // 128) * 128)
    if t >= HW:
        t = HW
    n_tok = pl.cdiv(HW, t)
    if B == 1 and n_tok < 2 and HW >= 256:
        n_tok = 2                       # single image: split across 2 cores
    # Balance token blocks so the trailing block is not tiny/ragged.
    t = min(HW, 128 * pl.cdiv(pl.cdiv(HW, n_tok), 128))
    n_tok = pl.cdiv(HW, t)
    return 1, t, (B, n_tok)


def _vmem_limit_bytes(block_f32_bytes, in_dtype_bytes):
    # Peak ~= 2x double-buffered input + 2x output (input dtype) +
    #         ~3 blocks of f32 elementwise temps, plus headroom.
    io_frac = in_dtype_bytes / 4.0
    need = int(block_f32_bytes * (4 * io_frac + 3)) + (2 << 20)
    cap = 64 << 20                      # conservative fallback: v7x per-TC VMEM
    try:
        info = pltpu.get_tpu_info()
        cap = int(getattr(info, "vmem_capacity_bytes", cap))
    except Exception:
        pass
    return int(min(max(32 << 20, need), (cap * 3) // 4))


# ---------------------------------------------------------------------------
# Wrapper
# ---------------------------------------------------------------------------
def layer_norm_nchw(x, weight, bias=None, *, ln_type="BiasFree",
                    two_pass_var=True, target_block_bytes=2 * 1024 * 1024):
    """LayerNorm over the channel dim of an NCHW tensor (Restormer LayerNorm).

    x: (B, C, H, W); weight: (C,); bias: (C,) required for ln_type='WithBias'.
    Returns the same shape/dtype as x.
    """
    B, C, H, W = x.shape
    assert weight.shape == (C,)
    HW = H * W

    x3 = x.reshape(B, C, HW)                     # pure view: no data movement
    bt, t, grid = _choose_tiling(B, C, HW, target_block_bytes)
    block_f32_bytes = bt * C * t * 4
    in_dtype_bytes = jnp.dtype(x.dtype).itemsize

    x_spec = pl.BlockSpec((bt, C, t), lambda i, j: (i, 0, j))
    w_spec = pl.BlockSpec((1, C, 1), lambda i, j: (0, 0, 0))   # resident params
    out_spec = pl.BlockSpec((bt, C, t), lambda i, j: (i, 0, j))

    compiler_params = pltpu.CompilerParams(
        dimension_semantics=("parallel", "parallel"),
        vmem_limit_bytes=_vmem_limit_bytes(block_f32_bytes, in_dtype_bytes),
    )

    w3 = weight.reshape(1, C, 1)
    if ln_type == "BiasFree":
        kernel = functools.partial(_biasfree_kernel, two_pass=two_pass_var)
        in_specs = [x_spec, w_spec]
        args = (x3, w3)
    else:
        assert bias is not None and bias.shape == (C,)
        b3 = bias.reshape(1, C, 1)
        kernel = functools.partial(_withbias_kernel, two_pass=two_pass_var)
        in_specs = [x_spec, w_spec, w_spec]
        args = (x3, w3, b3)

    out3 = pl.pallas_call(
        kernel,
        out_shape=jax.ShapeDtypeStruct((B, C, HW), x.dtype),
        grid_spec=pltpu.PrefetchScalarGridSpec(
            num_scalar_prefetch=0,
            grid=grid,
            in_specs=in_specs,
            out_specs=out_spec,
        ),
        compiler_params=compiler_params,
    )(*args)

    return out3.reshape(B, C, H, W)


# ---------------------------------------------------------------------------
# Reference + tests
# ---------------------------------------------------------------------------
def _reference(x, weight, bias, ln_type):
    xf = x.astype(jnp.float32)
    mu = jnp.mean(xf, axis=1, keepdims=True)
    var = jnp.mean((xf - mu) ** 2, axis=1, keepdims=True)
    w = weight.astype(jnp.float32).reshape(1, -1, 1, 1)
    inv = 1.0 / jnp.sqrt(var + _EPS)
    if ln_type == "BiasFree":
        out = xf * inv * w
    else:
        b = bias.astype(jnp.float32).reshape(1, -1, 1, 1)
        out = (xf - mu) * inv * w + b
    return out.astype(x.dtype)


if __name__ == "__main__":
    key = jax.random.PRNGKey(0)
    kx, kw, kb = jax.random.split(key, 3)

    # Shapes implied by the module: NCHW input, LayerNorm over channels.
    B, C, H, W = 2, 4, 16, 16
    x = jax.random.normal(kx, (B, C, H, W), dtype=jnp.float32)
    weight = 1.0 + 0.1 * jax.random.normal(kw, (C,), dtype=jnp.float32)
    bias = 0.1 * jax.random.normal(kb, (C,), dtype=jnp.float32)

    # BiasFree variant (batch-tiled path: whole images per block).
    out_bf = jax.block_until_ready(layer_norm_nchw(x, weight, ln_type="BiasFree"))
    ref_bf = _reference(x, weight, None, "BiasFree")
    assert out_bf.shape == x.shape and out_bf.dtype == x.dtype
    assert jnp.allclose(out_bf, ref_bf, atol=3e-5, rtol=1e-5)

    # WithBias variant.
    out_wb = jax.block_until_ready(
        layer_norm_nchw(x, weight, bias, ln_type="WithBias"))
    ref_wb = _reference(x, weight, bias, "WithBias")
    assert jnp.allclose(out_wb, ref_wb, atol=3e-5, rtol=1e-5)

    # Token-tiled path with a ragged trailing block (HW = 180, t = 128).
    B2, C2, H2, W2 = 1, 8, 12, 15
    x2 = jax.random.normal(kx, (B2, C2, H2, W2), dtype=jnp.float32)
    w2 = jnp.ones((C2,), dtype=jnp.float32)
    out2 = jax.block_until_ready(
        layer_norm_nchw(x2, w2, ln_type="BiasFree",
                        target_block_bytes=128 * C2 * 4))
    ref2 = _reference(x2, w2, None, "BiasFree")
    assert jnp.allclose(out2, ref2, atol=3e-5, rtol=1e-5)

    # bf16 input (batch-tiled path; tile sizing uses the f32 working set).
    xb = jax.random.normal(kb, (2, 8, 16, 16), dtype=jnp.bfloat16)
    wb = jnp.ones((8,), dtype=jnp.bfloat16)
    bb = jnp.zeros((8,), dtype=jnp.bfloat16)
    out3 = jax.block_until_ready(layer_norm_nchw(xb, wb, bb, ln_type="WithBias"))
    ref3 = _reference(xb, wb, bb, "WithBias")
    assert out3.dtype == jnp.bfloat16
    assert jnp.allclose(out3.astype(jnp.float32), ref3.astype(jnp.float32),
                        atol=2e-2, rtol=2e-2)

    print("KERNEL_OK")
</pallas_src>

<mosaic_0001>
module attributes {stable_mosaic.version = 11 : i64} {
  func.func @_biasfree_kernel(%arg0: i32, %arg1: i32, %arg2: memref<2x4x256xf32, #tpu.memory_space<vmem>>, %arg3: memref<1x4x1xf32, #tpu.memory_space<vmem>>, %arg4: memref<2x4x256xf32, #tpu.memory_space<vmem>>) attributes {dimension_semantics = [#tpu.dimension_semantics<parallel>, #tpu.dimension_semantics<parallel>], iteration_bounds = array<i64: 1, 1>, scalar_prefetch = 0 : i64, scratch_operands = 0 : i64, tpu.core_type = #tpu.core_type<tc>, window_params = [{transform_indices = @transform_0, window_bounds = array<i64: 2, 4, 256>}, {pipeline_mode = #tpu.pipeline_mode<synchronous>, transform_indices = @transform_1, window_bounds = array<i64: 1, 4, 1>}, {transform_indices = @transform_2, window_bounds = array<i64: 2, 4, 256>}]} {
    %c0 = arith.constant 0 : index
    %c0_0 = arith.constant 0 : index
    %c0_1 = arith.constant 0 : index
    %0 = vector.load %arg2[%c0, %c0_0, %c0_1] : memref<2x4x256xf32, #tpu.memory_space<vmem>>, vector<2x4x256xf32>
    %c0_2 = arith.constant 0 : index
    %c0_3 = arith.constant 0 : index
    %c0_4 = arith.constant 0 : index
    %1 = vector.load %arg3[%c0_2, %c0_3, %c0_4] : memref<1x4x1xf32, #tpu.memory_space<vmem>>, vector<1x4x1xf32>
    %cst = arith.constant dense<0.000000e+00> : vector<2x256xf32>
    %2 = vector.multi_reduction <add>, %0, %cst [1] : vector<2x4x256xf32> to vector<2x256xf32>
    %3 = vector.shape_cast %2 : vector<2x256xf32> to vector<2x1x256xf32>
    %cst_5 = arith.constant 4.000000e+00 : f32
    %4 = vector.broadcast %cst_5 : f32 to vector<2x1x256xf32>
    %5 = arith.divf %3, %4 : vector<2x1x256xf32>
    %6 = vector.broadcast %5 : vector<2x1x256xf32> to vector<2x4x256xf32>
    %7 = arith.subf %0, %6 : vector<2x4x256xf32>
    %8 = arith.mulf %7, %7 : vector<2x4x256xf32>
    %cst_6 = arith.constant dense<0.000000e+00> : vector<2x256xf32>
    %9 = vector.multi_reduction <add>, %8, %cst_6 [1] : vector<2x4x256xf32> to vector<2x256xf32>
    %10 = vector.shape_cast %9 : vector<2x256xf32> to vector<2x1x256xf32>
    %cst_7 = arith.constant 4.000000e+00 : f32
    %11 = vector.broadcast %cst_7 : f32 to vector<2x1x256xf32>
    %12 = arith.divf %10, %11 : vector<2x1x256xf32>
    %cst_8 = arith.constant 9.99999974E-6 : f32
    %13 = vector.broadcast %cst_8 : f32 to vector<2x1x256xf32>
    %14 = arith.addf %12, %13 : vector<2x1x256xf32>
    %15 = math.rsqrt %14 : vector<2x1x256xf32>
    %16 = vector.broadcast %15 : vector<2x1x256xf32> to vector<2x4x256xf32>
    %17 = arith.mulf %0, %16 : vector<2x4x256xf32>
    %18 = vector.broadcast %1 : vector<1x4x1xf32> to vector<2x4x256xf32>
    %19 = arith.mulf %17, %18 : vector<2x4x256xf32>
    %c0_9 = arith.constant 0 : index
    %c0_10 = arith.constant 0 : index
    %c0_11 = arith.constant 0 : index
    %20 = vector.load %arg4[%c0_9, %c0_10, %c0_11] : memref<2x4x256xf32, #tpu.memory_space<vmem>>, vector<2x4x256xf32>
    tpu.vector_store %arg4[%c0_9, %c0_10, %c0_11], %19 {strides = array<i32>} : memref<2x4x256xf32, #tpu.memory_space<vmem>>, vector<2x4x256xf32>,
    return
  }
  func.func @transform_0(%arg0: i32, %arg1: i32) -> (i32, i32, i32) {
    %c0_i32 = arith.constant 0 : i32
    %c0_i32_0 = arith.constant 0 : i32
    return %arg0, %c0_i32, %arg1 : i32, i32, i32
  }
  func.func @transform_1(%arg0: i32, %arg1: i32) -> (i32, i32, i32) {
    %c0_i32 = arith.constant 0 : i32
    %c0_i32_0 = arith.constant 0 : i32
    %c0_i32_1 = arith.constant 0 : i32
    %c0_i32_2 = arith.constant 0 : i32
    return %c0_i32, %c0_i32_0, %c0_i32_1 : i32, i32, i32
  }
  func.func @transform_2(%arg0: i32, %arg1: i32) -> (i32, i32, i32) {
    %c0_i32 = arith.constant 0 : i32
    %c0_i32_0 = arith.constant 0 : i32
    return %arg0, %c0_i32, %arg1 : i32, i32, i32
  }
}

</mosaic_0001>

<bundles_post_ra>
// kernel: tpu_custom_call.1
= control target key start
LH: loop header
LB: loop body
LE: loop exit
PB: predicated region body
PF: predicated region fallthrough
CT: control target
= control target key end

     0   :  { %7 = vsyncpa [#allocation3], 0  ;;  %s289_s0 = inlined_call_operand.hbm [shape: f32[2,4,256], index: 0, kind: input, shape index: {}]   ;;  %s290_s1 = inlined_call_operand.vmem [shape: f32[1,4,1], index: 1, kind: input, shape index: {}]   ;;  %s291_s2 = inlined_call_operand.hbm [shape: f32[2,4,256], index: 2, kind: output, shape index: {}]  }
   0x1   :  { %8 = vsyncpa [#allocation4], 0  ;;  %s231_s9 = smov [#allocation2]  }
   0x2   :  { %s14_s10 = sshll.u32 %s231_s9, 4  ;;  %s15_s10 = int_to_ptr.vmem [resolvable:$true] %s14_s10 }
   0x3   :  { %s195_s11 = scalar_lea.vmem %s15_s10, 256  ;;  %p200_p1 = scmp.lt.s32.totalorder %s15_s10, %s15_s10 }
   0x4   :  { %p196_p0 = scmp.ne.s32.totalorder %s15_s10, %s195_s11  ;;  %p201_p2 = scmp.lt.s32.totalorder %s195_s11, %s195_s11 }
   0x6   :  { %p202_p3 = por %p201_p2, %p200_p1 }
   0x8   :  { %p203_p4 = pnand %p202_p3, %p196_p0 }
   0xa   :  { %206 = shalt.err (!%p203_p4)
}
   0xb   :  { %s232_s12 = smov 128   ;;  %s233_s13 = smov 8  }
   0xc   :  { %20 = dma.hbm_to_vmem [thread:$0]  %s289_s0, 256, %s15_s10, [#allocation3], %s232_s12, %s232_s12, %s233_s13  }
   0xd   :  { %227 = dma.done.wait [#allocation3], 256  }
   0xe   :  { %228 = vsyncadd [#allocation3], 4294967040  ;;  %v234_v0 = vmov 0   ;;  %v28_v1 = vld [vmem:[%s290_s1] sm:$0xf]  ;;  %v263_v3 = vld [vmem:[#allocation2 + $0x8] sm:$0xff] }
   0xf   :  { %176 = vset.pattern.permute.xlu0 %v234_v0  ;;  %v261_v2 = vld [vmem:[#allocation2] sm:$0xff]  ;;  %vm35_vm0 = vcmask 1043456   ;;  %v32_v5 = vcombine.high %v263_v3, %v263_v3  ;;  %s236_s0 = smov [#allocation5]  }
  0x10   :  { %139 = vperm.xlu0 %176, %v28_v1   ;;  %v31_v4 = vcombine.high %v261_v2, %v261_v2  ;;  %v36_v6 = vsel %vm35_vm0, %v261_v2, 0.0  ;;  %v50_v8 = vsel %vm35_vm0, %v263_v3, 0.0  ;;  %s158_s1 = sshll.u32 %s236_s0, 4  ;;  %s159_s1 = int_to_ptr.vmem [resolvable:$true] %s158_s1 }
  0x11   :  { %v57_v9 = vsel %vm35_vm0, %v32_v5, 0.0  ;;  %v37_v10 = vrot.slane %v36_v6, 4  ;;  %v51_v12 = vrot.slane %v50_v8, 4  ;;  %s207_s18 = scalar_lea.vmem %s159_s1, 256  ;;  %p212_p6 = scmp.lt.s32.totalorder %s159_s1, %s159_s1 }
  0x12   :  { %v43_v7 = vsel %vm35_vm0, %v31_v4, 0.0  ;;  %v58_v13 = vrot.slane %v57_v9, 4  ;;  %p208_p5 = scmp.ne.s32.totalorder %s159_s1, %s207_s18  ;;  %p213_p7 = scmp.lt.s32.totalorder %s207_s18, %s207_s18 }
  0x13   :  { %v44_v11 = vrot.slane %v43_v7, 4  ;;  %v38_v14 = vadd.f32 %v37_v10, %v36_v6  ;;  %v52_v16 = vadd.f32 %v51_v12, %v50_v8 }
  0x14   :  { %v59_v17 = vadd.f32 %v58_v13, %v57_v9  ;;  %p214_p8 = por %p213_p7, %p212_p6 }
  0x15   :  { %v45_v15 = vadd.f32 %v44_v11, %v43_v7  ;;  %v39_v18 = vrot.slane %v38_v14, 2  ;;  %v53_v20 = vrot.slane %v52_v16, 2 }
  0x16   :  { %v60_v21 = vrot.slane %v59_v17, 2  ;;  %p215_p9 = pnand %p214_p8, %p208_p5 }
  0x17   :  { %v46_v19 = vrot.slane %v45_v15, 2  ;;  %v40_v22 = vadd.f32 %v39_v18, %v38_v14  ;;  %v54_v24 = vadd.f32 %v53_v20, %v52_v16 }
  0x18   :  { %v61_v25 = vadd.f32 %v60_v21, %v59_v17  ;;  %v235_v21 = vmov 839922192  }
  0x19   :  { %v47_v23 = vadd.f32 %v46_v19, %v45_v15  ;;  %v41_v26 = vrot.slane %v40_v22, 1  ;;  %v55_v28 = vrot.slane %v54_v24, 1 }
  0x1a   :  { %v62_v29 = vrot.slane %v61_v25, 1 }
  0x1b   :  { %v48_v27 = vrot.slane %v47_v23, 1  ;;  %v42_v30 = vadd.f32 %v41_v26, %v40_v22  ;;  %v56_v32 = vadd.f32 %v55_v28, %v54_v24  ;;  %v142_v22 = vunpack.c.l.s4 %v235_v21 }
  0x1c   :  { %v63_v33 = vadd.f32 %v62_v29, %v61_v25 }
  0x1d   :  { %v49_v31 = vadd.f32 %v48_v27, %v47_v23  ;;  %v65_v34 = vmul.f32 0.25, %v42_v30  ;;  %v67_v36 = vmul.f32 0.25, %v56_v32  ;;  %v144_v23 = vlaneseq }
  0x1e   :  { %v68_v37 = vmul.f32 0.25, %v63_v33  ;;  %v143_v27 = vunpack.c.0.s8 %v142_v22 }
  0x1f   :  { %v66_v35 = vmul.f32 0.25, %v49_v31  ;;  %v145_v28 = vshrl.u32 %v144_v23, 7 }
  0x20   :  { %v74_v39 = vcombine.low %v67_v36, %v68_v37 }
  0x21   :  { %v73_v38 = vcombine.low %v65_v34, %v66_v35  ;;  %v146_v31 = vsub.s32 %v143_v27, %v145_v28 }
  0x22   :  { %v78_v41 = vsub.f32 %v263_v3, %v74_v39 }
  0x23   :  { %v77_v40 = vsub.f32 %v261_v2, %v73_v38 }
  0x24   :  { %v80_v43 = vmul.f32 %v78_v41, %v78_v41 }
  0x25   :  { %v79_v42 = vmul.f32 %v77_v40, %v77_v40 }
  0x26   :  { %v84_v45 = vcombine.high %v80_v43, %v80_v43  ;;  %v101_v47 = vsel %vm35_vm0, %v80_v43, 0.0 }
  0x27   :  { %v83_v44 = vcombine.high %v79_v42, %v79_v42  ;;  %v87_v46 = vsel %vm35_vm0, %v79_v42, 0.0  ;;  %v102_v51 = vrot.slane %v101_v47, 4 }
  0x28   :  { %v88_v49 = vrot.slane %v87_v46, 4  ;;  %v108_v50 = vsel %vm35_vm0, %v84_v45, 0.0 }
  0x29   :  { %v94_v48 = vsel %vm35_vm0, %v83_v44, 0.0  ;;  %v109_v53 = vrot.slane %v108_v50, 4  ;;  %v103_v55 = vadd.f32 %v102_v51, %v101_v47 }
  0x2a   :  { %v95_v52 = vrot.slane %v94_v48, 4  ;;  %v89_v54 = vadd.f32 %v88_v49, %v87_v46 }
  0x2b   :  { %v110_v57 = vadd.f32 %v109_v53, %v108_v50  ;;  %v104_v59 = vrot.slane %v103_v55, 2 }
  0x2c   :  { %v96_v56 = vadd.f32 %v95_v52, %v94_v48  ;;  %v90_v58 = vrot.slane %v89_v54, 2 }
  0x2d   :  { %v111_v61 = vrot.slane %v110_v57, 2  ;;  %v105_v63 = vadd.f32 %v104_v59, %v103_v55 }
  0x2e   :  { %v97_v60 = vrot.slane %v96_v56, 2  ;;  %v91_v62 = vadd.f32 %v90_v58, %v89_v54 }
  0x2f   :  { %v112_v1 = vadd.f32 %v111_v61, %v110_v57  ;;  %v106_v5 = vrot.slane %v105_v63, 1 }
  0x30   :  { %v98_v0 = vadd.f32 %v97_v60, %v96_v56  ;;  %v92_v4 = vrot.slane %v91_v62, 1 }
  0x31   :  { %v113_v7 = vrot.slane %v112_v1, 1  ;;  %v107_v9 = vadd.f32 %v106_v5, %v105_v63 }
  0x32   :  { %v99_v6 = vrot.slane %v98_v0, 1  ;;  %v93_v8 = vadd.f32 %v92_v4, %v91_v62 }
  0x33   :  { %v114_v11 = vadd.f32 %v113_v7, %v112_v1  ;;  %v117_v13 = vmul.f32 0.25, %v107_v9 }
  0x34   :  { %v100_v10 = vadd.f32 %v99_v6, %v98_v0  ;;  %v115_v12 = vmul.f32 0.25, %v93_v8 }
  0x35   :  { %v118_v15 = vmul.f32 0.25, %v114_v11  ;;  %v121_v17 = vadd.f32 1e-05, %v117_v13 }
  0x36   :  { %v116_v14 = vmul.f32 0.25, %v100_v10  ;;  %v119_v16 = vadd.f32 1e-05, %v115_v12 }
  0x37   :  { %v122_v19 = vadd.f32 1e-05, %v118_v15 }
  0x38   :  { %v120_v18 = vadd.f32 1e-05, %v116_v14  ;;  %179 = vrsqrt.f32 %v119_v16 }
  0x39   :  { %181 = vrsqrt.f32 %v121_v17 }
  0x3a   :  { %183 = vrsqrt.f32 %v120_v18 }
  0x3b   :  { %185 = vrsqrt.f32 %v122_v19 }
  0x45   :  { %v180_v20 = vpop.eup %179 }
  0x46   :  { %v182_v24 = vpop.eup %181 }
  0x47   :  { %v184_v25 = vpop.eup %183 }
  0x48   :  { %v186_v26 = vpop.eup %185  ;;  %v131_v29 = vcombine.low %v180_v20, %v184_v25 }
  0x49   :  { %v132_v30 = vcombine.low %v182_v24, %v186_v26 }
  0x4a   :  { %v135_v32 = vmul.f32 %v131_v29, %v261_v2 }
  0x4b   :  { %v136_v33 = vmul.f32 %v132_v30, %v263_v3 }
  0x8b   :  { %v140_v34 = vpop.permute.xlu0 %139 }
  0x8c   :  { %v147_v35 = vrot.slane %v140_v34, %v146_v31 }
  0x8e   :  { %v149_v36 = vmul.f32 %v147_v35, %v135_v32  ;;  %v150_v37 = vmul.f32 %v147_v35, %v136_v33 }
  0x90   :  { %151 = vst [vmem:[#allocation5] sm:$0xff] %v149_v36  ;;  %152 = vst [vmem:[#allocation5 + $0x8] sm:$0xff] %v150_v37 }
  0x91   :  { %218 = shalt.err (!%p215_p9)
}
  0x92   :  { %164 = dma.vmem_to_hbm [thread:$0]  %s159_s1, 256, %s291_s2, [#allocation4], %s232_s12, %s232_s12, %s233_s13  }
  0x93   :  { %229 = dma.done.wait [#allocation4], 256  }
  0x94   :  { %230 = vsyncadd [#allocation4], 4294967040 }
  0x95   :  { %168 = vsyncpa [#allocation3], 1 }
  0x96   :  { %169 = vsyncpa [#allocation4], 1 }

</bundles_post_ra>
